<compile_context>
chip_gen: v7x
topology: tpu7x:2x2x1
jax: 0.10.0
libtpu: 0.0.40
codegen_flags: <defaults>
</compile_context>

<pallas_src>
import jax
import jax.numpy as jnp
from jax import lax
from jax.experimental import pallas as pl
from jax.experimental.pallas import tpu as pltpu


_LANE = 128
_INPUT_VMEM_BUDGET = 24 * 1024 * 1024   # bytes for pipelined (double-buffered) input blocks
_VMEM_LIMIT_BYTES = 48 * 1024 * 1024    # < 64 MiB physical VMEM on v7x; fine on v5e/v6e
_MAX_TK = 32768                         # keep per-step DMA runs reasonable


def _round_up(x, m):
    return ((x + m - 1) // m) * m


def _keep_dtype(dt):
    """Keep bf16/f32 as-is (MXU-native); cast anything else to f32."""
    dt = jnp.dtype(dt)
    if dt == jnp.dtype(jnp.bfloat16) or dt == jnp.dtype(jnp.float32):
        return dt
    return jnp.dtype(jnp.float32)


def _sim_loss_kernel(fs_ref, ft_ref, out_ref, gs_acc, gt_acc):
    """One grid step processes a (B, tk) slab of both student & teacher features."""
    k = pl.program_id(0)

    @pl.when(k == 0)
    def _():
        gs_acc[...] = jnp.zeros_like(gs_acc)
        gt_acc[...] = jnp.zeros_like(gt_acc)

    fs = fs_ref[...]  # (B, tk), f32 or bf16
    ft = ft_ref[...]  # (B, tk), f32 or bf16

    # G += f @ f^T over the feature (D) dimension. Expressed as dot_general
    # contracting dim 1 with dim 1 so no transposed operand is materialized
    # in VMEM; MXU accumulates in f32 regardless of input dtype.
    dn = (((1,), (1,)), ((), ()))
    gs_acc[...] += lax.dot_general(fs, fs, dn, preferred_element_type=jnp.float32)
    gt_acc[...] += lax.dot_general(ft, ft, dn, preferred_element_type=jnp.float32)

    @pl.when(k == pl.num_programs(0) - 1)
    def _():
        gs = gs_acc[...]
        gt = gt_acc[...]
        bsz = gs.shape[0]
        eps = jnp.float32(1e-12)  # matches torch.nn.functional.normalize default
        gs_n = gs / jnp.maximum(jnp.sqrt(jnp.sum(gs * gs, axis=1, keepdims=True)), eps)
        gt_n = gt / jnp.maximum(jnp.sqrt(jnp.sum(gt * gt, axis=1, keepdims=True)), eps)
        diff = gt_n - gs_n
        sq = diff * diff
        # reduce (B, B) -> (1, 1), keeping 2-D shapes for clean TPU layout
        row_sum = jnp.sum(sq, axis=0, keepdims=True)      # (1, B)
        total = jnp.sum(row_sum, axis=1, keepdims=True)   # (1, 1)
        out_ref[...] = total / jnp.float32(bsz * bsz)


def similarity_loss(f_s, f_t, tk=None):
    """Pallas version of Similarity.similarity_loss. Returns shape (1,) float32."""
    bsz = f_s.shape[0]
    assert f_t.shape[0] == bsz, "student/teacher batch sizes must match"

    dt_s = _keep_dtype(f_s.dtype)
    dt_t = _keep_dtype(f_t.dtype)
    fs = f_s.reshape(bsz, -1).astype(dt_s)
    ft = f_t.reshape(bsz, -1).astype(dt_t)
    assert fs.shape == ft.shape, "student/teacher must flatten to same (B, D)"
    d = fs.shape[1]

    # Pick the largest lane-aligned tk whose double-buffered (B, tk) blocks
    # (2 inputs x 2 pipeline buffers) fit the VMEM input budget.
    if tk is None:
        bytes_per_col = 2 * bsz * (dt_s.itemsize + dt_t.itemsize)
        tk = _INPUT_VMEM_BUDGET // max(bytes_per_col, 1)
        tk = min(tk, _MAX_TK)
    tk = min(tk, _round_up(d, _LANE))          # never bigger than (padded) D
    tk = max(_LANE, (tk // _LANE) * _LANE)     # lane-aligned, >= 128

    # Zero-pad D up to a multiple of tk (zero feature columns leave G unchanged),
    # keeping the intended tile size / pipeline instead of a full-width fallback.
    d_pad = _round_up(d, tk)
    if d_pad != d:
        fs = jnp.pad(fs, ((0, 0), (0, d_pad - d)))
        ft = jnp.pad(ft, ((0, 0), (0, d_pad - d)))

    grid = (d_pad // tk,)

    out = pl.pallas_call(
        _sim_loss_kernel,
        out_shape=jax.ShapeDtypeStruct((1, 1), jnp.float32),
        grid_spec=pltpu.PrefetchScalarGridSpec(
            num_scalar_prefetch=0,
            grid=grid,
            in_specs=[
                pl.BlockSpec((bsz, tk), lambda k: (0, k)),
                pl.BlockSpec((bsz, tk), lambda k: (0, k)),
            ],
            out_specs=pl.BlockSpec((1, 1), lambda k: (0, 0)),
            scratch_shapes=[
                pltpu.VMEM((bsz, bsz), jnp.float32),
                pltpu.VMEM((bsz, bsz), jnp.float32),
            ],
        ),
        compiler_params=pltpu.CompilerParams(
            dimension_semantics=("arbitrary",),   # D is a reduction axis
            vmem_limit_bytes=_VMEM_LIMIT_BYTES,
        ),
    )(fs, ft)
    return out.reshape(1)


def similarity_forward(g_s, g_t):
    """Pallas equivalent of Similarity.forward: list of per-pair scalar losses."""
    # TODO(synk): pairs with identical (B, D) could be batched into one
    # pallas_call (leading parallel grid axis) to amortize launch overhead.
    return [similarity_loss(f_s, f_t) for f_s, f_t in zip(g_s, g_t)]


def _similarity_loss_ref(f_s, f_t):
    """Pure-JAX f32 reference for correctness checking."""
    bsz = f_s.shape[0]
    fs = f_s.reshape(bsz, -1).astype(jnp.float32)
    ft = f_t.reshape(bsz, -1).astype(jnp.float32)
    gs = fs @ fs.T
    gt = ft @ ft.T
    gs = gs / jnp.maximum(jnp.linalg.norm(gs, axis=1, keepdims=True), 1e-12)
    gt = gt / jnp.maximum(jnp.linalg.norm(gt, axis=1, keepdims=True), 1e-12)
    diff = gt - gs
    return (jnp.sum(diff * diff) / (bsz * bsz)).reshape(1)


if __name__ == "__main__":
    key = jax.random.PRNGKey(0)
    keys = jax.random.split(key, 8)

    # Feature-map pairs (NCHW), as produced by intermediate conv layers.
    #  - two "nice" f32 maps (D divisible by 128),
    #  - one f32 map with D=105 (exercises the zero-padding path),
    #  - one bf16 map (exercises the no-upcast bf16 DMA/MXU path).
    g_s = [
        jax.random.normal(keys[0], (2, 4, 16, 16), dtype=jnp.float32),  # D = 1024
        jax.random.normal(keys[1], (2, 8, 8, 8), dtype=jnp.float32),    # D = 512
        jax.random.normal(keys[2], (2, 3, 7, 5), dtype=jnp.float32),    # D = 105
        jax.random.normal(keys[3], (2, 4, 16, 16), dtype=jnp.float32).astype(jnp.bfloat16),
    ]
    g_t = [
        jax.random.normal(keys[4], (2, 4, 16, 16), dtype=jnp.float32),
        jax.random.normal(keys[5], (2, 8, 8, 8), dtype=jnp.float32),
        jax.random.normal(keys[6], (2, 3, 7, 5), dtype=jnp.float32),
        jax.random.normal(keys[7], (2, 4, 16, 16), dtype=jnp.float32).astype(jnp.bfloat16),
    ]

    losses = similarity_forward(g_s, g_t)
    losses = [jax.block_until_ready(l) for l in losses]

    # f32 pairs: tight tolerance; bf16 pair: loose (bf16 MXU vs f32 reference).
    tols = [(1e-5, 1e-6), (1e-5, 1e-6), (1e-5, 1e-6), (1e-1, 1e-3)]
    for (fs, ft, got, (rtol, atol)) in zip(g_s, g_t, losses, tols):
        want = _similarity_loss_ref(fs, ft)
        assert jnp.allclose(got, want, rtol=rtol, atol=atol), (fs.shape, got, want)

    print("KERNEL_OK")
</pallas_src>

<mosaic_0001>
module attributes {stable_mosaic.version = 11 : i64} {
  func.func @_sim_loss_kernel(%arg0: i32, %arg1: memref<2x1024xf32, #tpu.memory_space<vmem>>, %arg2: memref<2x1024xf32, #tpu.memory_space<vmem>>, %arg3: memref<1x1xf32, #tpu.memory_space<vmem>>, %arg4: memref<2x2xf32, #tpu.memory_space<vmem>>, %arg5: memref<2x2xf32, #tpu.memory_space<vmem>>) attributes {dimension_semantics = [#tpu.dimension_semantics<arbitrary>], iteration_bounds = array<i64: 1>, scalar_prefetch = 0 : i64, scratch_operands = 2 : i64, tpu.core_type = #tpu.core_type<tc>, window_params = [{transform_indices = @transform_0, window_bounds = array<i64: 2, 1024>}, {transform_indices = @transform_1, window_bounds = array<i64: 2, 1024>}, {pipeline_mode = #tpu.pipeline_mode<synchronous>, transform_indices = @transform_2, window_bounds = array<i64: 1, 1>}]} {
    %c0_i32 = arith.constant 0 : i32
    %0 = arith.cmpi eq, %arg0, %c0_i32 : i32
    %1 = arith.extui %0 : i1 to i32
    %c0_i32_0 = arith.constant 0 : i32
    %2 = arith.cmpi ne, %1, %c0_i32_0 : i32
    scf.if %2 {
      %cst_15 = arith.constant 0.000000e+00 : f32
      %16 = vector.broadcast %cst_15 : f32 to vector<2x2xf32>
      %c0_16 = arith.constant 0 : index
      %c0_17 = arith.constant 0 : index
      %17 = vector.load %arg4[%c0_16, %c0_17] : memref<2x2xf32, #tpu.memory_space<vmem>>, vector<2x2xf32>
      tpu.vector_store %arg4[%c0_16, %c0_17], %16 {strides = array<i32>} : memref<2x2xf32, #tpu.memory_space<vmem>>, vector<2x2xf32>,
      %cst_18 = arith.constant 0.000000e+00 : f32
      %18 = vector.broadcast %cst_18 : f32 to vector<2x2xf32>
      %c0_19 = arith.constant 0 : index
      %c0_20 = arith.constant 0 : index
      %19 = vector.load %arg5[%c0_19, %c0_20] : memref<2x2xf32, #tpu.memory_space<vmem>>, vector<2x2xf32>
      tpu.vector_store %arg5[%c0_19, %c0_20], %18 {strides = array<i32>} : memref<2x2xf32, #tpu.memory_space<vmem>>, vector<2x2xf32>,
    } else {
    }
    %c0 = arith.constant 0 : index
    %c0_1 = arith.constant 0 : index
    %3 = vector.load %arg1[%c0, %c0_1] : memref<2x1024xf32, #tpu.memory_space<vmem>>, vector<2x1024xf32>
    %c0_2 = arith.constant 0 : index
    %c0_3 = arith.constant 0 : index
    %4 = vector.load %arg2[%c0_2, %c0_3] : memref<2x1024xf32, #tpu.memory_space<vmem>>, vector<2x1024xf32>
    %c0_4 = arith.constant 0 : index
    %c0_5 = arith.constant 0 : index
    %5 = vector.load %arg4[%c0_4, %c0_5] : memref<2x2xf32, #tpu.memory_space<vmem>>, vector<2x2xf32>
    %cst = arith.constant dense<0.000000e+00> : vector<2x2xf32>
    %6 = tpu.matmul %3, %3, %cst {dimension_numbers = #tpu.dot_dimension_numbers<[1], [1], [0], [0], [0, 0, 1, 0], [], []>} : vector<2x1024xf32>, vector<2x1024xf32>, vector<2x2xf32> -> vector<2x2xf32>
    %7 = arith.addf %5, %6 : vector<2x2xf32>
    %c0_6 = arith.constant 0 : index
    %c0_7 = arith.constant 0 : index
    %8 = vector.load %arg4[%c0_6, %c0_7] : memref<2x2xf32, #tpu.memory_space<vmem>>, vector<2x2xf32>
    tpu.vector_store %arg4[%c0_6, %c0_7], %7 {strides = array<i32>} : memref<2x2xf32, #tpu.memory_space<vmem>>, vector<2x2xf32>,
    %c0_8 = arith.constant 0 : index
    %c0_9 = arith.constant 0 : index
    %9 = vector.load %arg5[%c0_8, %c0_9] : memref<2x2xf32, #tpu.memory_space<vmem>>, vector<2x2xf32>
    %cst_10 = arith.constant dense<0.000000e+00> : vector<2x2xf32>
    %10 = tpu.matmul %4, %4, %cst_10 {dimension_numbers = #tpu.dot_dimension_numbers<[1], [1], [0], [0], [0, 0, 1, 0], [], []>} : vector<2x1024xf32>, vector<2x1024xf32>, vector<2x2xf32> -> vector<2x2xf32>
    %11 = arith.addf %9, %10 : vector<2x2xf32>
    %c0_11 = arith.constant 0 : index
    %c0_12 = arith.constant 0 : index
    %12 = vector.load %arg5[%c0_11, %c0_12] : memref<2x2xf32, #tpu.memory_space<vmem>>, vector<2x2xf32>
    tpu.vector_store %arg5[%c0_11, %c0_12], %11 {strides = array<i32>} : memref<2x2xf32, #tpu.memory_space<vmem>>, vector<2x2xf32>,
    %c0_i32_13 = arith.constant 0 : i32
    %13 = arith.cmpi eq, %arg0, %c0_i32_13 : i32
    %14 = arith.extui %13 : i1 to i32
    %c0_i32_14 = arith.constant 0 : i32
    %15 = arith.cmpi ne, %14, %c0_i32_14 : i32
    scf.if %15 {
      %c0_15 = arith.constant 0 : index
      %c0_16 = arith.constant 0 : index
      %16 = vector.load %arg4[%c0_15, %c0_16] : memref<2x2xf32, #tpu.memory_space<vmem>>, vector<2x2xf32>
      %c0_17 = arith.constant 0 : index
      %c0_18 = arith.constant 0 : index
      %17 = vector.load %arg5[%c0_17, %c0_18] : memref<2x2xf32, #tpu.memory_space<vmem>>, vector<2x2xf32>
      %18 = arith.mulf %16, %16 : vector<2x2xf32>
      %cst_19 = arith.constant dense<0.000000e+00> : vector<2xf32>
      %19 = vector.multi_reduction <add>, %18, %cst_19 [1] : vector<2x2xf32> to vector<2xf32>
      %20 = vector.shape_cast %19 : vector<2xf32> to vector<2x1xf32>
      %21 = math.sqrt %20 : vector<2x1xf32>
      %cst_20 = arith.constant 9.99999996E-13 : f32
      %22 = vector.broadcast %cst_20 : f32 to vector<2x1xf32>
      %23 = arith.maximumf %21, %22 : vector<2x1xf32>
      %24 = vector.broadcast %23 : vector<2x1xf32> to vector<2x2xf32>
      %25 = arith.divf %16, %24 : vector<2x2xf32>
      %26 = arith.mulf %17, %17 : vector<2x2xf32>
      %cst_21 = arith.constant dense<0.000000e+00> : vector<2xf32>
      %27 = vector.multi_reduction <add>, %26, %cst_21 [1] : vector<2x2xf32> to vector<2xf32>
      %28 = vector.shape_cast %27 : vector<2xf32> to vector<2x1xf32>
      %29 = math.sqrt %28 : vector<2x1xf32>
      %cst_22 = arith.constant 9.99999996E-13 : f32
      %30 = vector.broadcast %cst_22 : f32 to vector<2x1xf32>
      %31 = arith.maximumf %29, %30 : vector<2x1xf32>
      %32 = vector.broadcast %31 : vector<2x1xf32> to vector<2x2xf32>
      %33 = arith.divf %17, %32 : vector<2x2xf32>
      %34 = arith.subf %33, %25 : vector<2x2xf32>
      %35 = arith.mulf %34, %34 : vector<2x2xf32>
      %cst_23 = arith.constant dense<0.000000e+00> : vector<2xf32>
      %36 = vector.multi_reduction <add>, %35, %cst_23 [0] : vector<2x2xf32> to vector<2xf32>
      %37 = vector.shape_cast %36 : vector<2xf32> to vector<1x2xf32>
      %cst_24 = arith.constant dense<0.000000e+00> : vector<1xf32>
      %38 = vector.multi_reduction <add>, %37, %cst_24 [1] : vector<1x2xf32> to vector<1xf32>
      %39 = vector.shape_cast %38 : vector<1xf32> to vector<1x1xf32>
      %cst_25 = arith.constant 4.000000e+00 : f32
      %40 = vector.broadcast %cst_25 : f32 to vector<1x1xf32>
      %41 = arith.divf %39, %40 : vector<1x1xf32>
      %c0_26 = arith.constant 0 : index
      %c0_27 = arith.constant 0 : index
      %42 = vector.load %arg3[%c0_26, %c0_27] : memref<1x1xf32, #tpu.memory_space<vmem>>, vector<1x1xf32>
      tpu.vector_store %arg3[%c0_26, %c0_27], %41 {strides = array<i32>} : memref<1x1xf32, #tpu.memory_space<vmem>>, vector<1x1xf32>,
    } else {
    }
    return
  }
  func.func @transform_0(%arg0: i32) -> (i32, i32) {
    %c0_i32 = arith.constant 0 : i32
    %c0_i32_0 = arith.constant 0 : i32
    return %c0_i32, %arg0 : i32, i32
  }
  func.func @transform_1(%arg0: i32) -> (i32, i32) {
    %c0_i32 = arith.constant 0 : i32
    %c0_i32_0 = arith.constant 0 : i32
    return %c0_i32, %arg0 : i32, i32
  }
  func.func @transform_2(%arg0: i32) -> (i32, i32) {
    %c0_i32 = arith.constant 0 : i32
    %c0_i32_0 = arith.constant 0 : i32
    %c0_i32_1 = arith.constant 0 : i32
    return %c0_i32, %c0_i32_0 : i32, i32
  }
}

</mosaic_0001>

<bundles_post_ra>
// kernel: tpu_custom_call.1
= control target key start
LH: loop header
LB: loop body
LE: loop exit
PB: predicated region body
PF: predicated region fallthrough
CT: control target
= control target key end

     0   :  { %7 = vsyncpa [#allocation5], 0  ;;  %s920_s0 = inlined_call_operand.hbm [shape: f32[2,1024], index: 0, kind: input, shape index: {}]   ;;  %s921_s1 = inlined_call_operand.hbm [shape: f32[2,1024], index: 1, kind: input, shape index: {}]   ;;  %s922_s2 = inlined_call_operand.hbm [shape: f32[1,1], index: 2, kind: output, shape index: {}]  }
   0x1   :  { %8 = vsyncpa [#allocation8], 0 }
   0x2   :  { %9 = vsyncpa [#allocation6], 0  ;;  %s857_s9 = smov [#allocation4]   ;;  %s858_s11 = smov [#allocation7]  }
   0x3   :  { %s16_s10 = sshll.u32 %s857_s9, 4  ;;  %s26_s12 = sshll.u32 %s858_s11, 4  ;;  %s17_s10 = int_to_ptr.vmem [resolvable:$true] %s16_s10  ;;  %s27_s12 = int_to_ptr.vmem [resolvable:$true] %s26_s12 }
   0x4   :  { %s785_s15 = scalar_lea.hbm %s920_s0, 256 }
   0x5   :  { %p786_p0 = scmp.ne.s32.totalorder %s920_s0, %s785_s15  ;;  %p789_p1 = scmp.lt.u32.totalorder %s785_s15, %s920_s0 }
   0x7   :  { %p791_p2 = pnand %p789_p1, %p786_p0 }
   0x9   :  { %794 = shalt.err (!%p791_p2)
}
   0xa   :  { %s795_s20 = scalar_lea.vmem %s17_s10, 256  ;;  %p800_p4 = scmp.lt.s32.totalorder %s17_s10, %s17_s10 }
   0xb   :  { %p796_p3 = scmp.ne.s32.totalorder %s17_s10, %s795_s20  ;;  %p801_p5 = scmp.lt.s32.totalorder %s795_s20, %s795_s20 }
   0xd   :  { %p802_p6 = por %p801_p5, %p800_p4 }
   0xf   :  { %p803_p7 = pnand %p802_p6, %p796_p3 }
  0x11   :  { %806 = shalt.err (!%p803_p7)
}
  0x12   :  { %19 = dma.hbm_to_vmem [thread:$0]  %s920_s0, 256, %s17_s10, [#allocation5]  }
  0x13   :  { %s807_s25 = scalar_lea.hbm %s921_s1, 256 }
  0x14   :  { %p808_p8 = scmp.ne.s32.totalorder %s921_s1, %s807_s25  ;;  %p811_p9 = scmp.lt.u32.totalorder %s807_s25, %s921_s1 }
  0x16   :  { %p813_p10 = pnand %p811_p9, %p808_p8 }
  0x18   :  { %816 = shalt.err (!%p813_p10)
}
  0x19   :  { %s817_s30 = scalar_lea.vmem %s27_s12, 256  ;;  %p822_p12 = scmp.lt.s32.totalorder %s27_s12, %s27_s12 }
  0x1a   :  { %p818_p11 = scmp.ne.s32.totalorder %s27_s12, %s817_s30  ;;  %p823_p13 = scmp.lt.s32.totalorder %s817_s30, %s817_s30 }
  0x1c   :  { %p824_p0 = por %p823_p13, %p822_p12 }
  0x1e   :  { %p825_p1 = pnand %p824_p0, %p818_p11 }
  0x20   :  { %828 = shalt.err (!%p825_p1)
}
  0x21   :  { %29 = dma.hbm_to_vmem [thread:$0]  %s921_s1, 256, %s27_s12, [#allocation8]  }
  0x22   :  { %851 = dma.done.wait [#allocation5], 256  }
  0x23   :  { %852 = vsyncadd [#allocation5], 4294967040 }
  0x24   :  { %853 = dma.done.wait [#allocation8], 256  }
  0x25   :  { %854 = vsyncadd [#allocation8], 4294967040  ;;  %v54_v0 = vlaneseq  ;;  %v859_v1 = vmov 1983009808   ;;  %v43_v6 = vld [vmem:[#allocation4] sm:$0xff]  ;;  %v44_v7 = vld [vmem:[#allocation4 + $0x8] sm:$0xff] }
  0x26   :  { %v52_v2 = vunpack.c.l.s4 %v859_v1  ;;  %v45_v8 = vld [vmem:[#allocation7] sm:$0xff]  ;;  %v50_v10 = vcombine.high %v43_v6, %v43_v6  ;;  %v67_v12 = vcombine.high %v44_v7, %v44_v7  ;;  %v46_v13 = vld [vmem:[#allocation7 + $0x8] sm:$0xff]  ;;  %vm40_vm0 = vcmask 9216   ;;  %s861_s1 = smov [#allocation9]  }
  0x27   :  { %v55_v3 = vshrl.u32 %v54_v0, 7  ;;  %v378_v15 = vcombine.high %v45_v8, %v45_v8  ;;  %v395_v20 = vcombine.high %v46_v13, %v46_v13  ;;  %v860_v30 = vmov 0.0   ;;  %s758_s4 = sshll.u32 %s861_s1, 4  ;;  %s759_s4 = int_to_ptr.vmem [resolvable:$true] %s758_s4 }
  0x28   :  { %v53_v4 = vunpack.c.0.s8 %v52_v2  ;;  %41 = vst.msk [vmem:[#allocation2] sm:$0x3] %vm40_vm0, %v860_v30  ;;  %42 = vst.msk [vmem:[#allocation3] sm:$0x3] %vm40_vm0, %v860_v30  ;;  %vm744_vm5 = vcmask 15360   ;;  %vm750_vm6 = vcmask 0   ;;  %p834_p3 = scmp.lt.s32.totalorder %s759_s4, %s759_s4 }
  0x29   :  { %s829_s5 = scalar_lea.vmem %s759_s4, 16  ;;  %s833_s6 = scalar_lea.vmem %s759_s4, 32 }
  0x2a   :  { %v56_v5 = vsub.s32 %v53_v4, %v55_v3  ;;  %p830_p2 = scmp.ne.s32.totalorder %s759_s4, %s829_s5  ;;  %p835_p4 = scmp.lt.s32.totalorder %s833_s6, %s829_s5 }
  0x2c   :  { %v57_v9 = vrot.slane %v43_v6, %v56_v5  ;;  %v74_v11 = vrot.slane %v44_v7, %v56_v5  ;;  %v385_v14 = vrot.slane %v45_v8, %v56_v5  ;;  %v64_v17 = vrot.slane %v50_v10, %v56_v5  ;;  %p836_p5 = por %p835_p4, %p834_p3 }
  0x2d   :  { %v81_v19 = vrot.slane %v67_v12, %v56_v5  ;;  %v392_v23 = vrot.slane %v378_v15, %v56_v5  ;;  %v402_v25 = vrot.slane %v46_v13, %v56_v5  ;;  %v409_v27 = vrot.slane %v395_v20, %v56_v5 }
  0x2e   :  { %v65_v16 = vcombine.high %v57_v9, %v57_v9  ;;  %v82_v18 = vcombine.high %v74_v11, %v74_v11  ;;  %v66_v21 = vcombine.high %v64_v17, %v64_v17  ;;  %v393_v24 = vcombine.high %v385_v14, %v385_v14  ;;  %p837_p6 = pnand %p836_p5, %p830_p2 }
  0x2f   :  { %v83_v22 = vcombine.high %v81_v19, %v81_v19  ;;  %v394_v26 = vcombine.high %v392_v23, %v392_v23  ;;  %v410_v28 = vcombine.high %v402_v25, %v402_v25  ;;  %v411_v29 = vcombine.high %v409_v27, %v409_v27  ;;  %v47_v39 = vld [vmem:[#allocation2] sm:$0x3]  ;;  %v375_v52 = vld [vmem:[#allocation3] sm:$0x3] }
  0x30   :  { %92 = vmatprep.subr.mxu0 %v65_v16  ;;  %156 = vmatprep.mubr.f32.mxu0 %v65_v16 }
  0x31   :  { %93 = vmatpush1.xpose.msra.mxu0 %v57_v9  ;;  %162 = vmatprep.subr.mxu1 %v66_v21 }
  0x32   :  { %232 = vmatprep.subr.mxu0 %v82_v18  ;;  %163 = vmatpush1.xpose.msra.mxu1 %v64_v17 }
  0x33   :  { %226 = vmatprep.mubr.f32.mxu1 %v66_v21  ;;  %302 = vmatprep.subr.mxu1 %v83_v22 }
  0x34   :  { %157 = vmatmul.mubr.f32.vlgmr.msra.gmra.mrb[0].mxu0 %v57_v9 }
  0x35   :  { %233 = vmatpush1.xpose.msra.mxu0 %v74_v11  ;;  %296 = vmatprep.mubr.f32.mxu0 %v82_v18 }
  0x36   :  { %227 = vmatmul.mubr.f32.vlgmr.msra.gmra.mrb[0].mxu1 %v64_v17  ;;  %420 = vmatprep.subr.mxu0 %v393_v24 }
  0x37   :  { %303 = vmatpush1.xpose.msra.mxu1 %v81_v19  ;;  %366 = vmatprep.mubr.f32.mxu1 %v83_v22 }
  0x38   :  { %297 = vmatmul.mubr.f32.vlgmr.msra.gmra.mrb[2].mxu0 %v74_v11  ;;  %490 = vmatprep.subr.mxu1 %v394_v26 }
  0x39   :  { %421 = vmatpush1.xpose.msra.mxu0 %v385_v14  ;;  %484 = vmatprep.mubr.f32.mxu0 %v393_v24 }
  0x3a   :  { %367 = vmatmul.mubr.f32.vlgmr.msra.gmra.mrb[2].mxu1 %v81_v19  ;;  %560 = vmatprep.subr.mxu0 %v410_v28 }
  0x3b   :  { %491 = vmatpush1.xpose.msra.mxu1 %v392_v23  ;;  %554 = vmatprep.mubr.f32.mxu1 %v394_v26 }
  0x3c   :  { %485 = vmatmul.mubr.f32.vlgmr.msra.gmra.mrb[4].mxu0 %v385_v14  ;;  %630 = vmatprep.subr.mxu1 %v411_v29 }
  0x3d   :  { %561 = vmatpush1.xpose.msra.mxu0 %v402_v25  ;;  %624 = vmatprep.mubr.f32.mxu0 %v410_v28 }
  0x3e   :  { %555 = vmatmul.mubr.f32.vlgmr.msra.gmra.mrb[4].mxu1 %v392_v23 }
  0x3f   :  { %631 = vmatpush1.xpose.msra.mxu1 %v409_v27  ;;  %694 = vmatprep.mubr.f32.mxu1 %v411_v29 }
  0x40   :  { %625 = vmatmul.mubr.f32.vlgmr.msra.gmra.mrb[6].mxu0 %v402_v25 }
  0x42   :  { %695 = vmatmul.mubr.f32.vlgmr.msra.gmra.mrb[6].mxu1 %v409_v27 }
 0x107   :  { %v158_v31 = vpop.f32.mrb[0].mxu0 }
 0x108   :  { %v160_v32 = vpop.f32.mrb[1].mxu0 }
 0x109   :  { %v228_v33 = vpop.f32.mrb[0].mxu1 }
 0x10a   :  { %v229_v34 = vadd.f32 %v228_v33, %v158_v31  ;;  %v230_v35 = vpop.f32.mrb[1].mxu1 }
 0x10b   :  { %v298_v36 = vpop.f32.mrb[2].mxu0 }
 0x10c   :  { %v299_v37 = vadd.f32 %v298_v36, %v229_v34  ;;  %v300_v38 = vpop.f32.mrb[3].mxu0 }
 0x10d   :  { %v368_v40 = vpop.f32.mrb[2].mxu1 }
 0x10e   :  { %v369_v41 = vadd.f32 %v368_v40, %v299_v37  ;;  %v370_v42 = vpop.f32.mrb[3].mxu1 }
 0x10f   :  { %v486_v43 = vpop.f32.mrb[4].mxu0 }
 0x110   :  { %v372_v44 = vadd.f32 %v369_v41, %v47_v39  ;;  %v488_v45 = vpop.f32.mrb[5].mxu0 }
 0x111   :  { %v556_v46 = vpop.f32.mrb[4].mxu1 }
 0x112   :  { %374 = vst.msk [vmem:[#allocation2] sm:$0x3] %vm40_vm0, %v372_v44  ;;  %v557_v47 = vadd.f32 %v556_v46, %v486_v43  ;;  %v558_v48 = vpop.f32.mrb[5].mxu1 }
 0x113   :  { %v626_v49 = vpop.f32.mrb[6].mxu0 }
 0x114   :  { %v627_v50 = vadd.f32 %v626_v49, %v557_v47  ;;  %v628_v51 = vpop.f32.mrb[7].mxu0 }
 0x115   :  { %v696_v53 = vpop.f32.mrb[6].mxu1 }
 0x116   :  { %v697_v54 = vadd.f32 %v696_v53, %v627_v50  ;;  %v698_v55 = vpop.f32.mrb[7].mxu1 }
 0x118   :  { %v700_v56 = vadd.f32 %v697_v54, %v375_v52 }
 0x119   :  { %v705_v57 = vld [vmem:[#allocation2] sm:$0x3] }
 0x11a   :  { %701 = vst.msk [vmem:[#allocation3] sm:$0x3] %vm40_vm0, %v700_v56  ;;  %v707_v58 = vmul.f32 %v705_v57, %v705_v57 }
 0x11c   :  { %v708_v59 = vsel %vm40_vm0, %v707_v58, 0.0 }
 0x11d   :  { %709 = vadd.xlane.f32.xlu0 %v708_v59 }
 0x121   :  { %v706_v60 = vld [vmem:[#allocation3] sm:$0x3] }
 0x122   :  { %v721_v61 = vmul.f32 %v706_v60, %v706_v60 }
 0x124   :  { %v722_v62 = vsel %vm40_vm0, %v721_v61, 0.0 }
 0x125   :  { %723 = vadd.xlane.f32.xlu0 %v722_v62 }
 0x1aa   :  { %v710_v63 = vpop.xlane.xlu0 %709 }
 0x1ab   :  { %777 = vrsqrt.f32 %v710_v63  ;;  %vm713_vm1 = vcmp.eq.f32.partialorder %v710_v63, inf  ;;  %v716_v4 = vand.u32 2147483648, %v710_v63  ;;  %vm715_vm2 = vcmp.eq.f32.partialorder %v710_v63, 0.0 }
 0x1b2   :  { %v724_v0 = vpop.xlane.xlu0 %723 }
 0x1b3   :  { %779 = vrsqrt.f32 %v724_v0  ;;  %vm727_vm3 = vcmp.eq.f32.partialorder %v724_v0, inf  ;;  %v730_v9 = vand.u32 2147483648, %v724_v0  ;;  %vm729_vm4 = vcmp.eq.f32.partialorder %v724_v0, 0.0 }
 0x1b5   :  { %v778_v1 = vpop.eup %777 }
 0x1b6   :  { %v712_v2 = vmul.f32 %v778_v1, %v710_v63 }
 0x1b8   :  { %v714_v3 = vsel %vm713_vm1, %v710_v63, %v712_v2 }
 0x1b9   :  { %v717_v5 = vsel %vm715_vm2, %v716_v4, %v714_v3 }
 0x1ba   :  { %v718_v7 = vmax.f32 %v717_v5, 1e-12 }
 0x1bc   :  { %781 = vrcp.f32 %v718_v7 }
 0x1bd   :  { %v780_v6 = vpop.eup %779 }
 0x1be   :  { %v726_v8 = vmul.f32 %v780_v6, %v724_v0 }
 0x1c0   :  { %v728_v10 = vsel %vm727_vm3, %v724_v0, %v726_v8 }
 0x1c1   :  { %v731_v11 = vsel %vm729_vm4, %v730_v9, %v728_v10 }
 0x1c2   :  { %v732_v12 = vmax.f32 %v731_v11, 1e-12 }
 0x1c4   :  { %783 = vrcp.f32 %v732_v12 }
 0x1c6   :  { %v782_v13 = vpop.eup %781 }
 0x1c7   :  { %v720_v15 = vmul.f32 %v782_v13, %v705_v57 }
 0x1ce   :  { %v784_v14 = vpop.eup %783 }
 0x1cf   :  { %v734_v16 = vmul.f32 %v784_v14, %v706_v60 }
 0x1d1   :  { %v735_v17 = vsub.f32 %v734_v16, %v720_v15 }
 0x1d3   :  { %v736_v18 = vmul.f32 %v735_v17, %v735_v17 }
 0x1d5   :  { %v737_v19 = vsel %vm40_vm0, %v736_v18, 0.0 }
 0x1d6   :  { %v738_v20 = vrot.slane %v737_v19, 4 }
 0x1d8   :  { %v739_v21 = vadd.f32 %v738_v20, %v737_v19 }
 0x1da   :  { %v740_v22 = vrot.slane %v739_v21, 2 }
 0x1dc   :  { %v741_v23 = vadd.f32 %v740_v22, %v739_v21 }
 0x1de   :  { %v742_v24 = vrot.slane %v741_v23, 1 }
 0x1e0   :  { %v743_v25 = vadd.f32 %v742_v24, %v741_v23 }
 0x1e2   :  { %v745_v26 = vsel %vm744_vm5, %v743_v25, 0.0 }
 0x1e3   :  { %746 = vadd.xlane.f32.xlu1 %v745_v26 }
 0x270   :  { %v747_v27 = vpop.xlane.xlu1 %746 }
 0x271   :  { %v749_v28 = vmul.f32 0.25, %v747_v27 }
 0x273   :  { %751 = vst.msk [vmem:[#allocation9] sm:$0x1] %vm750_vm6, %v749_v28 }
 0x274   :  { %840 = shalt.err (!%p837_p6)
}
 0x275   :  { %s841_s9 = scalar_lea.hbm %s922_s2, 16 }
 0x276   :  { %p842_p7 = scmp.ne.s32.totalorder %s922_s2, %s841_s9  ;;  %p845_p8 = scmp.lt.u32.totalorder %s841_s9, %s922_s2 }
 0x278   :  { %p847_p9 = pnand %p845_p8, %p842_p7 }
 0x27a   :  { %850 = shalt.err (!%p847_p9)
}
 0x27b   :  { %761 = dma.vmem_to_hbm [thread:$0]  %s759_s4, 16, %s922_s2, [#allocation6]  }
 0x27c   :  { %855 = dma.done.wait [#allocation6], 16  }
 0x27d   :  { %856 = vsyncadd [#allocation6], 4294967280 }
 0x27e   :  { %765 = vsyncpa [#allocation5], 1 }
 0x27f   :  { %766 = vsyncpa [#allocation8], 1 }
 0x280   :  { %767 = vsyncpa [#allocation6], 1 }

</bundles_post_ra>
